<compile_context>
chip_gen: v7x
topology: tpu7x:2x2x1
jax: 0.10.0
libtpu: 0.0.40
codegen_flags: <defaults>
</compile_context>

<pallas_src>
import functools
import math

import jax
import jax.numpy as jnp
from jax.experimental import pallas as pl
from jax.experimental.pallas import tpu as pltpu

EPS = 1e-5
_SENTINEL = -1e30        # marks "missing neighbour" entries in the conv2 patch
_SENTINEL_CUT = -1e29
_VMEM_LIMIT_BYTES = 32 * 1024 * 1024


# ---------------------------------------------------------------------------
# Tiling helpers
# ---------------------------------------------------------------------------

def _round_up(n, m):
    return ((n + m - 1) // m) * m


@functools.lru_cache(maxsize=1)
def _vmem_budget_bytes():
    """Per-generation block budget (v7x: 64 MiB VMEM, v5e/v6e: 128 MiB)."""
    try:
        cap = int(pltpu.get_tpu_info().vmem_capacity_bytes)
    except Exception:
        cap = 64 * 1024 * 1024
    return min(cap // 4, 16 * 1024 * 1024)


def _pick_row_tile(n_rows, bytes_per_row, max_tile=2048):
    """Largest row tile (multiple of 8) that fits the VMEM budget."""
    t = _vmem_budget_bytes() // max(int(bytes_per_row), 1)
    t = min(t, max_tile, _round_up(n_rows, 8))
    return max(8, (t // 8) * 8)


def _pad_rows(x, mult, fill=0.0):
    pad = _round_up(x.shape[0], mult) - x.shape[0]
    if pad == 0:
        return x
    widths = ((0, pad),) + ((0, 0),) * (x.ndim - 1)
    return jnp.pad(x, widths, constant_values=fill)


# ---------------------------------------------------------------------------
# Pallas kernels
# ---------------------------------------------------------------------------

def _stats(y):
    """Per-channel (sum, sum_sq) for this row tile -> (1, 2, Cout) f32."""
    s = jnp.sum(y, axis=0, keepdims=True)
    q = jnp.sum(y * y, axis=0, keepdims=True)
    return jnp.concatenate([s, q], axis=0)[None]


def _conv_stats_kernel(x_ref, w_ref, y_ref, st_ref):
    """y = x @ w plus partial BN batch statistics (identity-skip variant)."""
    y = jnp.dot(x_ref[...], w_ref[...], preferred_element_type=jnp.float32)
    y_ref[...] = y.astype(y_ref.dtype)
    st_ref[...] = _stats(y)


def _conv_ds_stats_kernel(x_ref, w_ref, wd_ref, y_ref, yd_ref, st_ref, std_ref,
                          *, cin, center):
    """conv1 (ks=3) fused with the 1x1 downsample conv + both BN stats."""
    y = jnp.dot(x_ref[...], w_ref[...], preferred_element_type=jnp.float32)
    # Centre slice of the gathered patch == the point's own features.
    xc = x_ref[:, center * cin:(center + 1) * cin]
    yd = jnp.dot(xc, wd_ref[...], preferred_element_type=jnp.float32)
    y_ref[...] = y.astype(y_ref.dtype)
    yd_ref[...] = yd.astype(yd_ref.dtype)
    st_ref[...] = _stats(y)
    std_ref[...] = _stats(yd)


def _bnrelu_conv_stats_kernel(x_ref, s_ref, b_ref, w_ref, y_ref, st_ref):
    """conv2 with BN1 + ReLU fused onto the gathered (raw conv1) patch.

    Missing neighbours were gathered as a large negative sentinel so they still
    contribute exactly zero after the affine + relu (regardless of BN sign).
    """
    x = x_ref[...].astype(jnp.float32)
    h = jnp.where(x > _SENTINEL_CUT,
                  jnp.maximum(x * s_ref[...] + b_ref[...], 0.0),
                  0.0)
    y = jnp.dot(h.astype(w_ref.dtype), w_ref[...],
                preferred_element_type=jnp.float32)
    y_ref[...] = y.astype(y_ref.dtype)
    st_ref[...] = _stats(y)


def _bn_add_bn_relu_kernel(a_ref, b_ref, sa_ref, ba_ref, sb_ref, bb_ref, o_ref):
    """o = relu(bn(a) + bn(b)) with per-lane affine params (lane-dense)."""
    a = a_ref[...].astype(jnp.float32) * sa_ref[...] + ba_ref[...]
    b = b_ref[...].astype(jnp.float32) * sb_ref[...] + bb_ref[...]
    o_ref[...] = jnp.maximum(a + b, 0.0).astype(o_ref.dtype)


# ---------------------------------------------------------------------------
# Pallas wrappers
# ---------------------------------------------------------------------------

def _conv_params():
    return pltpu.CompilerParams(dimension_semantics=("parallel",),
                                vmem_limit_bytes=_VMEM_LIMIT_BYTES)


def conv_bn_stats(patch, w, *, out_dtype):
    P, K = patch.shape
    Cout = w.shape[1]
    row_bytes = 2 * K * patch.dtype.itemsize + 4 * Cout
    tile = _pick_row_tile(P, row_bytes)
    xp = _pad_rows(patch, tile)               # zero rows contribute 0 to stats
    T = xp.shape[0] // tile
    y, st = pl.pallas_call(
        _conv_stats_kernel,
        out_shape=(jax.ShapeDtypeStruct((xp.shape[0], Cout), out_dtype),
                   jax.ShapeDtypeStruct((T, 2, Cout), jnp.float32)),
        grid=(T,),
        in_specs=[pl.BlockSpec((tile, K), lambda i: (i, 0)),
                  pl.BlockSpec((K, Cout), lambda i: (0, 0))],
        out_specs=(pl.BlockSpec((tile, Cout), lambda i: (i, 0)),
                   pl.BlockSpec((1, 2, Cout), lambda i: (i, 0, 0))),
        compiler_params=_conv_params(),
    )(xp, w)
    return y[:P], st


def conv_ds_bn_stats(patch, w, wd, *, cin, center, out_dtype):
    P, K = patch.shape
    Cout = w.shape[1]
    row_bytes = 2 * K * patch.dtype.itemsize + 8 * Cout
    tile = _pick_row_tile(P, row_bytes)
    xp = _pad_rows(patch, tile)               # zero rows contribute 0 to stats
    T = xp.shape[0] // tile
    kern = functools.partial(_conv_ds_stats_kernel, cin=cin, center=center)
    y, yd, st, std = pl.pallas_call(
        kern,
        out_shape=(jax.ShapeDtypeStruct((xp.shape[0], Cout), out_dtype),
                   jax.ShapeDtypeStruct((xp.shape[0], Cout), out_dtype),
                   jax.ShapeDtypeStruct((T, 2, Cout), jnp.float32),
                   jax.ShapeDtypeStruct((T, 2, Cout), jnp.float32)),
        grid=(T,),
        in_specs=[pl.BlockSpec((tile, K), lambda i: (i, 0)),
                  pl.BlockSpec((K, Cout), lambda i: (0, 0)),
                  pl.BlockSpec((cin, Cout), lambda i: (0, 0))],
        out_specs=(pl.BlockSpec((tile, Cout), lambda i: (i, 0)),
                   pl.BlockSpec((tile, Cout), lambda i: (i, 0)),
                   pl.BlockSpec((1, 2, Cout), lambda i: (i, 0, 0)),
                   pl.BlockSpec((1, 2, Cout), lambda i: (i, 0, 0))),
        compiler_params=_conv_params(),
    )(xp, w, wd)
    return y[:P], yd[:P], st, std


def bnrelu_conv_bn_stats(patch, scale_t, bias_t, w, *, out_dtype):
    P, K = patch.shape
    Cout = w.shape[1]
    row_bytes = (2 * patch.dtype.itemsize + 4) * K + 4 * Cout
    tile = _pick_row_tile(P, row_bytes)
    xp = _pad_rows(patch, tile, fill=_SENTINEL)   # sentinel rows -> h == 0
    T = xp.shape[0] // tile
    y, st = pl.pallas_call(
        _bnrelu_conv_stats_kernel,
        out_shape=(jax.ShapeDtypeStruct((xp.shape[0], Cout), out_dtype),
                   jax.ShapeDtypeStruct((T, 2, Cout), jnp.float32)),
        grid=(T,),
        in_specs=[pl.BlockSpec((tile, K), lambda i: (i, 0)),
                  pl.BlockSpec((1, K), lambda i: (0, 0)),
                  pl.BlockSpec((1, K), lambda i: (0, 0)),
                  pl.BlockSpec((K, Cout), lambda i: (0, 0))],
        out_specs=(pl.BlockSpec((tile, Cout), lambda i: (i, 0)),
                   pl.BlockSpec((1, 2, Cout), lambda i: (i, 0, 0))),
        compiler_params=_conv_params(),
    )(xp, scale_t, bias_t, w)
    return y[:P], st


def _bn_add_bn_relu_call(a, b, sa, ba, sb, bb, out_dtype):
    R, L = a.shape
    row_bytes = 2 * (a.dtype.itemsize + b.dtype.itemsize) * L + 4 * L
    tile = _pick_row_tile(R, row_bytes, max_tile=4096)
    ap = _pad_rows(a, tile)
    bp = _pad_rows(b, tile)
    T = ap.shape[0] // tile
    out = pl.pallas_call(
        _bn_add_bn_relu_kernel,
        out_shape=jax.ShapeDtypeStruct((ap.shape[0], L), out_dtype),
        grid=(T,),
        in_specs=[pl.BlockSpec((tile, L), lambda i: (i, 0)),
                  pl.BlockSpec((tile, L), lambda i: (i, 0)),
                  pl.BlockSpec((1, L), lambda i: (0, 0)),
                  pl.BlockSpec((1, L), lambda i: (0, 0)),
                  pl.BlockSpec((1, L), lambda i: (0, 0)),
                  pl.BlockSpec((1, L), lambda i: (0, 0))],
        out_specs=pl.BlockSpec((tile, L), lambda i: (i, 0)),
        compiler_params=pltpu.CompilerParams(
            dimension_semantics=("parallel",),
            vmem_limit_bytes=_VMEM_LIMIT_BYTES),
    )(ap, bp, sa, ba, sb, bb)
    return out[:R]


def bn_add_bn_relu(a, b, sa, ba, sb, bb, *, out_dtype=jnp.float32):
    """out = relu(bn(a) + bn(b)); uses a lane-dense [*, 128] view when possible."""
    P, C = a.shape
    if C % 128 != 0 and 128 % C == 0 and (P * C) % 128 == 0:
        rep = 128 // C
        a2 = a.reshape(-1, 128)
        b2 = b.reshape(-1, 128)
        sa2 = jnp.tile(sa.reshape(1, C), (1, rep))
        ba2 = jnp.tile(ba.reshape(1, C), (1, rep))
        sb2 = jnp.tile(sb.reshape(1, C), (1, rep))
        bb2 = jnp.tile(bb.reshape(1, C), (1, rep))
        out = _bn_add_bn_relu_call(a2, b2, sa2, ba2, sb2, bb2, out_dtype)
        return out.reshape(P, C)
    return _bn_add_bn_relu_call(a, b, sa.reshape(1, C), ba.reshape(1, C),
                                sb.reshape(1, C), bb.reshape(1, C), out_dtype)


# ---------------------------------------------------------------------------
# Glue: sparse kernel-map construction + patch gather (coordinate hashing)
# ---------------------------------------------------------------------------

def build_kernel_map(coords, grid_size, ks=3, dilation=1):
    """nbr_idx[p, k] = index of neighbour of point p at kernel offset k, or -1."""
    P = coords.shape[0]
    lookup = jnp.full((grid_size,) * 3, -1, dtype=jnp.int32)
    lookup = lookup.at[coords[:, 0], coords[:, 1], coords[:, 2]].set(
        jnp.arange(P, dtype=jnp.int32))
    r = (ks - 1) // 2
    offs = jnp.array(
        [(dz, dy, dx)
         for dz in range(-r, r + 1)
         for dy in range(-r, r + 1)
         for dx in range(-r, r + 1)],
        dtype=jnp.int32) * dilation
    nc = coords[:, None, :] + offs[None, :, :]                    # [P, K^3, 3]
    in_bounds = jnp.all((nc >= 0) & (nc < grid_size), axis=-1)
    ncc = jnp.clip(nc, 0, grid_size - 1)
    nbr = lookup[ncc[..., 0], ncc[..., 1], ncc[..., 2]]
    return jnp.where(in_bounds, nbr, -1)


def gather_patches(feats, nbr_idx, fill=0.0, dtype=None):
    """[P, C] -> [P, K^3 * C]; missing neighbours filled with `fill`."""
    x = feats if dtype is None else feats.astype(dtype)
    valid = nbr_idx >= 0
    idx = jnp.maximum(nbr_idx, 0)
    g = jnp.where(valid[..., None], x[idx], jnp.asarray(fill, x.dtype))
    return g.reshape(x.shape[0], -1)


def bn_scale_bias_from_partials(st, n, gamma, beta, eps=EPS):
    """Fold per-tile partial (sum, sum_sq) into a per-channel affine."""
    s = jnp.sum(st[:, 0, :], axis=0)
    q = jnp.sum(st[:, 1, :], axis=0)
    mean = s / n
    var = jnp.maximum(q / n - mean * mean, 0.0)     # guard cancellation
    scale = gamma.reshape(-1) / jnp.sqrt(var + eps)
    bias = beta.reshape(-1) - mean * scale
    return scale.reshape(1, -1), bias.reshape(1, -1)


# ---------------------------------------------------------------------------
# ResidualBlock forward
# ---------------------------------------------------------------------------

def residual_block_forward(feats, nbr_idx, params, *, inc, outc, stride=1,
                           compute_dtype=jnp.bfloat16):
    assert stride == 1, "stride > 1 sparse downsampling not implemented"
    P = feats.shape[0]
    kvol = nbr_idx.shape[1]
    center = kvol // 2
    cd = compute_dtype

    w1 = params["w1"].astype(cd)
    w2 = params["w2"].astype(cd)

    # conv1 (ks=3), fused with the 1x1 downsample conv when it exists
    p1 = gather_patches(feats, nbr_idx, fill=0.0, dtype=cd)
    if inc == outc and stride == 1:
        y1, st1 = conv_bn_stats(p1, w1, out_dtype=cd)
        yd = feats                                      # identity skip (no BN)
        scd = jnp.ones((1, outc), jnp.float32)
        bid = jnp.zeros((1, outc), jnp.float32)
    else:
        wd = params["wd"].astype(cd)
        y1, yd, st1, std = conv_ds_bn_stats(p1, w1, wd, cin=inc, center=center,
                                            out_dtype=cd)
        scd, bid = bn_scale_bias_from_partials(std, P, params["gd"], params["bd"])
    sc1, bi1 = bn_scale_bias_from_partials(st1, P, params["g1"], params["b1"])

    # conv2 (ks=3): BN1 + ReLU fused into the conv kernel (applied to the
    # gathered raw y1 patch; missing neighbours carry a sentinel so they still
    # contribute zero).
    p2 = gather_patches(y1, nbr_idx, fill=_SENTINEL, dtype=cd)
    sc1_t = jnp.tile(sc1, (1, kvol))
    bi1_t = jnp.tile(bi1, (1, kvol))
    y2, st2 = bnrelu_conv_bn_stats(p2, sc1_t, bi1_t, w2, out_dtype=cd)
    sc2, bi2 = bn_scale_bias_from_partials(st2, P, params["g2"], params["b2"])

    # out = relu(bn2(conv2(...)) + bn_d(downsample(x)))   (lane-dense epilogue)
    return bn_add_bn_relu(y2, yd, sc2, bi2, scd, bid, out_dtype=jnp.float32)


# ---------------------------------------------------------------------------
# Pure-JAX reference (mirrors the matmul input dtype for a fair check)
# ---------------------------------------------------------------------------

def reference_forward(feats, nbr_idx, params, *, inc, outc,
                      compute_dtype=jnp.bfloat16):
    cd = compute_dtype

    def bn(x, g, b):
        m = x.mean(0, keepdims=True)
        v = x.var(0, keepdims=True)
        return (x - m) / jnp.sqrt(v + EPS) * g.reshape(1, -1) + b.reshape(1, -1)

    def conv(p, w):
        return jnp.dot(p.astype(cd), w.astype(cd),
                       preferred_element_type=jnp.float32)

    def gather(x):
        valid = nbr_idx >= 0
        idx = jnp.maximum(nbr_idx, 0)
        g = jnp.where(valid[..., None], x[idx], 0.0)
        return g.reshape(x.shape[0], -1)

    y1 = conv(gather(feats), params["w1"])
    h1 = jnp.maximum(bn(y1, params["g1"], params["b1"]), 0.0)
    y2 = conv(gather(h1), params["w2"])
    if inc == outc:
        res = feats
    else:
        res = bn(conv(feats, params["wd"]), params["gd"], params["bd"])
    return jnp.maximum(bn(y2, params["g2"], params["b2"]) + res, 0.0)


# ---------------------------------------------------------------------------
# Main
# ---------------------------------------------------------------------------

if __name__ == "__main__":
    C_IN, C_OUT, KS, DIL, STRIDE = 4, 8, 3, 1, 1
    GRID, P = 8, 256                                   # 256 occupied voxels

    key = jax.random.PRNGKey(0)
    k_perm, k_feat, k_w1, k_w2, k_wd = jax.random.split(key, 5)

    occ = jax.random.permutation(k_perm, GRID ** 3)[:P]
    coords = jnp.stack(jnp.unravel_index(occ, (GRID, GRID, GRID)), axis=-1)
    coords = coords.astype(jnp.int32)
    feats = jax.random.normal(k_feat, (P, C_IN), dtype=jnp.float32)

    KVOL = KS ** 3
    params = {
        "w1": (jax.random.normal(k_w1, (KVOL * C_IN, C_OUT), jnp.float32)
               * (1.0 / math.sqrt(KVOL * C_IN))),
        "w2": (jax.random.normal(k_w2, (KVOL * C_OUT, C_OUT), jnp.float32)
               * (1.0 / math.sqrt(KVOL * C_OUT))),
        "wd": (jax.random.normal(k_wd, (C_IN, C_OUT), jnp.float32)
               * (1.0 / math.sqrt(C_IN))),
        # BatchNorm affine params at their PyTorch defaults (gamma=1, beta=0)
        "g1": jnp.ones((1, C_OUT), jnp.float32),
        "b1": jnp.zeros((1, C_OUT), jnp.float32),
        "g2": jnp.ones((1, C_OUT), jnp.float32),
        "b2": jnp.zeros((1, C_OUT), jnp.float32),
        "gd": jnp.ones((1, C_OUT), jnp.float32),
        "bd": jnp.zeros((1, C_OUT), jnp.float32),
    }

    nbr_idx = build_kernel_map(coords, GRID, ks=KS, dilation=DIL)

    # --- float32 path: tight correctness check against the pure-JAX reference.
    out_f32 = residual_block_forward(feats, nbr_idx, params, inc=C_IN,
                                     outc=C_OUT, stride=STRIDE,
                                     compute_dtype=jnp.float32)
    out_f32 = jax.block_until_ready(out_f32)
    ref_f32 = reference_forward(feats, nbr_idx, params, inc=C_IN, outc=C_OUT,
                                compute_dtype=jnp.float32)
    assert out_f32.shape == (P, C_OUT)
    assert jnp.allclose(out_f32, ref_f32, rtol=2e-4, atol=2e-4), \
        "f32 mismatch vs reference"

    # --- bf16 path (default): halves HBM traffic of the gathered patches and
    #     intermediate activations (the kernels accumulate in f32 on the MXU).
    out_bf16 = residual_block_forward(feats, nbr_idx, params, inc=C_IN,
                                      outc=C_OUT, stride=STRIDE,
                                      compute_dtype=jnp.bfloat16)
    out_bf16 = jax.block_until_ready(out_bf16)
    ref_bf16 = reference_forward(feats, nbr_idx, params, inc=C_IN, outc=C_OUT,
                                 compute_dtype=jnp.bfloat16)
    assert out_bf16.shape == (P, C_OUT)
    assert jnp.allclose(out_bf16, ref_bf16, rtol=5e-2, atol=5e-2), \
        "bf16 mismatch vs reference"

    print("KERNEL_OK")
</pallas_src>

<mosaic_0001>
module attributes {stable_mosaic.version = 11 : i64} {
  func.func @_conv_ds_stats_kernel(%arg0: i32, %arg1: memref<256x108xf32, #tpu.memory_space<vmem>>, %arg2: memref<108x8xf32, #tpu.memory_space<vmem>>, %arg3: memref<4x8xf32, #tpu.memory_space<vmem>>, %arg4: memref<256x8xf32, #tpu.memory_space<vmem>>, %arg5: memref<256x8xf32, #tpu.memory_space<vmem>>, %arg6: memref<1x2x8xf32, #tpu.memory_space<vmem>>, %arg7: memref<1x2x8xf32, #tpu.memory_space<vmem>>) attributes {dimension_semantics = [#tpu.dimension_semantics<parallel>], iteration_bounds = array<i64: 1>, scalar_prefetch = 0 : i64, scratch_operands = 0 : i64, tpu.core_type = #tpu.core_type<tc>, window_params = [{transform_indices = @transform_0, window_bounds = array<i64: 256, 108>}, {pipeline_mode = #tpu.pipeline_mode<synchronous>, transform_indices = @transform_1, window_bounds = array<i64: 108, 8>}, {pipeline_mode = #tpu.pipeline_mode<synchronous>, transform_indices = @transform_2, window_bounds = array<i64: 4, 8>}, {transform_indices = @transform_3, window_bounds = array<i64: 256, 8>}, {transform_indices = @transform_4, window_bounds = array<i64: 256, 8>}, {transform_indices = @transform_5, window_bounds = array<i64: 1, 2, 8>}, {transform_indices = @transform_6, window_bounds = array<i64: 1, 2, 8>}]} {
    %c0 = arith.constant 0 : index
    %c0_0 = arith.constant 0 : index
    %0 = vector.load %arg1[%c0, %c0_0] : memref<256x108xf32, #tpu.memory_space<vmem>>, vector<256x108xf32>
    %c0_1 = arith.constant 0 : index
    %c0_2 = arith.constant 0 : index
    %1 = vector.load %arg2[%c0_1, %c0_2] : memref<108x8xf32, #tpu.memory_space<vmem>>, vector<108x8xf32>
    %cst = arith.constant dense<0.000000e+00> : vector<256x8xf32>
    %2 = tpu.matmul %0, %1, %cst {dimension_numbers = #tpu.dot_dimension_numbers<[1], [0], [0], [1], [0, 0, 1, 1], [], []>} : vector<256x108xf32>, vector<108x8xf32>, vector<256x8xf32> -> vector<256x8xf32>
    %c0_3 = arith.constant 0 : index
    %c52 = arith.constant 52 : index
    %3 = vector.load %arg1[%c0_3, %c52] : memref<256x108xf32, #tpu.memory_space<vmem>>, vector<256x4xf32>
    %c0_4 = arith.constant 0 : index
    %c0_5 = arith.constant 0 : index
    %4 = vector.load %arg3[%c0_4, %c0_5] : memref<4x8xf32, #tpu.memory_space<vmem>>, vector<4x8xf32>
    %cst_6 = arith.constant dense<0.000000e+00> : vector<256x8xf32>
    %5 = tpu.matmul %3, %4, %cst_6 {dimension_numbers = #tpu.dot_dimension_numbers<[1], [0], [0], [1], [0, 0, 1, 1], [], []>} : vector<256x4xf32>, vector<4x8xf32>, vector<256x8xf32> -> vector<256x8xf32>
    %c0_7 = arith.constant 0 : index
    %c0_8 = arith.constant 0 : index
    %6 = vector.load %arg4[%c0_7, %c0_8] : memref<256x8xf32, #tpu.memory_space<vmem>>, vector<256x8xf32>
    tpu.vector_store %arg4[%c0_7, %c0_8], %2 {strides = array<i32>} : memref<256x8xf32, #tpu.memory_space<vmem>>, vector<256x8xf32>,
    %c0_9 = arith.constant 0 : index
    %c0_10 = arith.constant 0 : index
    %7 = vector.load %arg5[%c0_9, %c0_10] : memref<256x8xf32, #tpu.memory_space<vmem>>, vector<256x8xf32>
    tpu.vector_store %arg5[%c0_9, %c0_10], %5 {strides = array<i32>} : memref<256x8xf32, #tpu.memory_space<vmem>>, vector<256x8xf32>,
    %cst_11 = arith.constant dense<0.000000e+00> : vector<8xf32>
    %8 = vector.multi_reduction <add>, %2, %cst_11 [0] : vector<256x8xf32> to vector<8xf32>
    %9 = vector.shape_cast %8 : vector<8xf32> to vector<1x8xf32>
    %10 = arith.mulf %2, %2 : vector<256x8xf32>
    %cst_12 = arith.constant dense<0.000000e+00> : vector<8xf32>
    %11 = vector.multi_reduction <add>, %10, %cst_12 [0] : vector<256x8xf32> to vector<8xf32>
    %12 = vector.shape_cast %11 : vector<8xf32> to vector<1x8xf32>
    %13 = tpu.concatenate %9, %12 in 0 : vector<1x8xf32>, vector<1x8xf32> -> vector<2x8xf32>
    %14 = vector.shape_cast %13 : vector<2x8xf32> to vector<1x2x8xf32>
    %c0_13 = arith.constant 0 : index
    %c0_14 = arith.constant 0 : index
    %c0_15 = arith.constant 0 : index
    %15 = vector.load %arg6[%c0_13, %c0_14, %c0_15] : memref<1x2x8xf32, #tpu.memory_space<vmem>>, vector<1x2x8xf32>
    tpu.vector_store %arg6[%c0_13, %c0_14, %c0_15], %14 {strides = array<i32>} : memref<1x2x8xf32, #tpu.memory_space<vmem>>, vector<1x2x8xf32>,
    %cst_16 = arith.constant dense<0.000000e+00> : vector<8xf32>
    %16 = vector.multi_reduction <add>, %5, %cst_16 [0] : vector<256x8xf32> to vector<8xf32>
    %17 = vector.shape_cast %16 : vector<8xf32> to vector<1x8xf32>
    %18 = arith.mulf %5, %5 : vector<256x8xf32>
    %cst_17 = arith.constant dense<0.000000e+00> : vector<8xf32>
    %19 = vector.multi_reduction <add>, %18, %cst_17 [0] : vector<256x8xf32> to vector<8xf32>
    %20 = vector.shape_cast %19 : vector<8xf32> to vector<1x8xf32>
    %21 = tpu.concatenate %17, %20 in 0 : vector<1x8xf32>, vector<1x8xf32> -> vector<2x8xf32>
    %22 = vector.shape_cast %21 : vector<2x8xf32> to vector<1x2x8xf32>
    %c0_18 = arith.constant 0 : index
    %c0_19 = arith.constant 0 : index
    %c0_20 = arith.constant 0 : index
    %23 = vector.load %arg7[%c0_18, %c0_19, %c0_20] : memref<1x2x8xf32, #tpu.memory_space<vmem>>, vector<1x2x8xf32>
    tpu.vector_store %arg7[%c0_18, %c0_19, %c0_20], %22 {strides = array<i32>} : memref<1x2x8xf32, #tpu.memory_space<vmem>>, vector<1x2x8xf32>,
    return
  }
  func.func @transform_0(%arg0: i32) -> (i32, i32) {
    %c0_i32 = arith.constant 0 : i32
    %c0_i32_0 = arith.constant 0 : i32
    return %arg0, %c0_i32 : i32, i32
  }
  func.func @transform_1(%arg0: i32) -> (i32, i32) {
    %c0_i32 = arith.constant 0 : i32
    %c0_i32_0 = arith.constant 0 : i32
    %c0_i32_1 = arith.constant 0 : i32
    return %c0_i32, %c0_i32_0 : i32, i32
  }
  func.func @transform_2(%arg0: i32) -> (i32, i32) {
    %c0_i32 = arith.constant 0 : i32
    %c0_i32_0 = arith.constant 0 : i32
    %c0_i32_1 = arith.constant 0 : i32
    return %c0_i32, %c0_i32_0 : i32, i32
  }
  func.func @transform_3(%arg0: i32) -> (i32, i32) {
    %c0_i32 = arith.constant 0 : i32
    %c0_i32_0 = arith.constant 0 : i32
    return %arg0, %c0_i32 : i32, i32
  }
  func.func @transform_4(%arg0: i32) -> (i32, i32) {
    %c0_i32 = arith.constant 0 : i32
    %c0_i32_0 = arith.constant 0 : i32
    return %arg0, %c0_i32 : i32, i32
  }
  func.func @transform_5(%arg0: i32) -> (i32, i32, i32) {
    %c0_i32 = arith.constant 0 : i32
    %c0_i32_0 = arith.constant 0 : i32
    %c0_i32_1 = arith.constant 0 : i32
    return %arg0, %c0_i32, %c0_i32_0 : i32, i32, i32
  }
  func.func @transform_6(%arg0: i32) -> (i32, i32, i32) {
    %c0_i32 = arith.constant 0 : i32
    %c0_i32_0 = arith.constant 0 : i32
    %c0_i32_1 = arith.constant 0 : i32
    return %arg0, %c0_i32, %c0_i32_0 : i32, i32, i32
  }
}

</mosaic_0001>

<bundles_post_ra>
// kernel: tpu_custom_call.1
= control target key start
LH: loop header
LB: loop body
LE: loop exit
PB: predicated region body
PF: predicated region fallthrough
CT: control target
= control target key end

     0   :  { %12 = vsyncpa [#allocation3], 0  ;;  %s1550_s25 = smov 76   ;;  %vm66_vm0 = vcmask 883712   ;;  %vm163_vm1 = vcmask 1043456   ;;  %s2301_s0 = inlined_call_operand.vmem [shape: f32[256,108], index: 0, kind: input, shape index: {}]   ;;  %s2302_s1 = inlined_call_operand.vmem [shape: f32[108,8], index: 1, kind: input, shape index: {}]   ;;  %s2303_s2 = inlined_call_operand.vmem [shape: f32[4,8], index: 2, kind: input, shape index: {}]   ;;  %s2304_s3 = inlined_call_operand.vmem [shape: f32[256,8], index: 3, kind: output, shape index: {0}]   ;;  %s2305_s4 = inlined_call_operand.vmem [shape: f32[256,8], index: 4, kind: output, shape index: {1}]   ;;  %s2306_s5 = inlined_call_operand.hbm [shape: f32[1,2,8], index: 5, kind: output, shape index: {2}]   ;;  %s2307_s6 = inlined_call_operand.hbm [shape: f32[1,2,8], index: 6, kind: output, shape index: {3}]  }
   0x1   :  { %v20_v0 = vld [vmem:[%s2301_s0] sm:$0xff]  ;;  %v1595_v1 = vld [vmem:[%s2301_s0 + $0x10] sm:$0xff]  ;;  %v1603_v2 = vld [vmem:[%s2301_s0 + $0x8] sm:$0xff] }
   0x2   :  { %393 = vrot.lane.b32.xlu0 %v20_v0, %s1550_s25  ;;  %397 = vrot.lane.b32.xlu1 %v1595_v1, %s1550_s25  ;;  %v1608_v3 = vld [vmem:[%s2301_s0 + $0x18] sm:$0xff]  ;;  %v1618_v4 = vld [vmem:[%s2301_s0 + $0x20] sm:$0xff] }
   0x3   :  { %1370 = vmatprep.mubr.msk.f32.mxu0 %vm66_vm0, %v20_v0  ;;  %v1623_v5 = vld [vmem:[%s2301_s0 + $0x28] sm:$0xff]  ;;  %v1632_v6 = vld [vmem:[%s2301_s0 + $0x30] sm:$0xff]  ;;  %v1637_v7 = vld [vmem:[%s2301_s0 + $0x38] sm:$0xff] }
   0x4   :  { %v52_v8 = vld [vmem:[%s2302_s1] sm:$0xff]  ;;  %v53_v9 = vld [vmem:[%s2302_s1 + $0x8] sm:$0xff]  ;;  %v54_v10 = vld [vmem:[%s2302_s1 + $0x10] sm:$0xff] }
   0x5   :  { %v55_v11 = vld [vmem:[%s2302_s1 + $0x18] sm:$0xff]  ;;  %v1468_v12 = vpack.c.bf16 %v53_v9, %v52_v8  ;;  %v1658_v13 = vld [vmem:[%s2301_s0 + $0x40] sm:$0xff]  ;;  %v1663_v14 = vld [vmem:[%s2301_s0 + $0x48] sm:$0xff] }
   0x6   :  { %395 = vrot.lane.b32.xlu0 %v1603_v2, %s1550_s25  ;;  %399 = vrot.lane.b32.xlu1 %v1608_v3, %s1550_s25  ;;  %v1472_v15 = vpack.c.bf16 %v55_v11, %v54_v10  ;;  %v56_v16 = vld [vmem:[%s2302_s1 + $0x20] sm:$0xff]  ;;  %v57_v17 = vld [vmem:[%s2302_s1 + $0x28] sm:$0xff] }
   0x7   :  { %1469 = vmatprep.subr.bf16.mxu0 %v1468_v12  ;;  %v392_v18 = vld [vmem:[%s2303_s2] sm:$0xf] }
   0x8   :  { %1471 = vmatpush3.bf16.msra.mxu0 %v1468_v12 }
   0xa   :  { %401 = vrot.lane.b32.xlu0 %v1618_v4, %s1550_s25  ;;  %403 = vrot.lane.b32.xlu1 %v1623_v5, %s1550_s25 }
   0xe   :  { %405 = vrot.lane.b32.xlu0 %v1632_v6, %s1550_s25  ;;  %407 = vrot.lane.b32.xlu1 %v1637_v7, %s1550_s25 }
  0x12   :  { %409 = vrot.lane.b32.xlu0 %v1658_v13, %s1550_s25  ;;  %411 = vrot.lane.b32.xlu1 %v1663_v14, %s1550_s25 }
  0x13   :  { %13 = vsyncpa [#allocation5], 0  ;;  %v1681_v19 = vld [vmem:[%s2301_s0 + $0x50] sm:$0xff]  ;;  %v1686_v20 = vld [vmem:[%s2301_s0 + $0x58] sm:$0xff]  ;;  %1473 = vmatprep.subr.bf16.mxu0 %v1472_v15  ;;  %v1476_v21 = vpack.c.bf16 %v57_v17, %v56_v16  ;;  %1418 = vmatprep.subr.msk.mxu1 %vm163_vm1, %v392_v18  ;;  %vm1551_vm2 = vmmov 1   ;;  %vm457_vm4 = vcmask 31744  }
  0x14   :  { %v58_v22 = vld [vmem:[%s2302_s1 + $0x30] sm:$0xff]  ;;  %v59_v23 = vld [vmem:[%s2302_s1 + $0x38] sm:$0xff]  ;;  %1419 = vmatpush3.msk.msra.mxu1 %vm163_vm1, %v392_v18  ;;  %1475 = vmatpush3.bf16.msra.mxu0 %v1472_v15  ;;  %v1703_v24 = vld [vmem:[%s2301_s0 + $0x60] sm:$0xff]  ;;  %vm750_vm5 = vcmask 64512   ;;  %vm985_vm6 = vcmask 1040384   ;;  %vm987_vm7 = vcmask 58368  }
  0x15   :  { %v1708_v25 = vld [vmem:[%s2301_s0 + $0x68] sm:$0xff]  ;;  %1477 = vmatprep.subr.bf16.mxu0 %v1476_v21  ;;  %v1480_v26 = vpack.c.bf16 %v59_v23, %v58_v22  ;;  %v60_v27 = vld [vmem:[%s2302_s1 + $0x40] sm:$0xff]  ;;  %v1723_v29 = vld [vmem:[%s2301_s0 + $0x70] sm:$0xff] }
  0x16   :  { %413 = vrot.lane.b32.xlu0 %v1681_v19, %s1550_s25  ;;  %415 = vrot.lane.b32.xlu1 %v1686_v20, %s1550_s25  ;;  %v61_v28 = vld [vmem:[%s2302_s1 + $0x48] sm:$0xff]  ;;  %v1728_v30 = vld [vmem:[%s2301_s0 + $0x78] sm:$0xff]  ;;  %vm1493_vm3 = vmpackc.low %vm163_vm1, %vm1551_vm2 }
  0x17   :  { %v1484_v31 = vpack.c.bf16 %v61_v28, %v60_v27  ;;  %v62_v32 = vld [vmem:[%s2302_s1 + $0x50] sm:$0xff]  ;;  %v63_v33 = vld [vmem:[%s2302_s1 + $0x58] sm:$0xff]  ;;  %v36_v34 = vld [vmem:[%s2301_s0 + $0x80] sm:$0xff] }
  0x18   :  { %1479 = vmatpush3.bf16.msra.mxu0 %v1476_v21  ;;  %v37_v35 = vld [vmem:[%s2301_s0 + $0x88] sm:$0xff]  ;;  %v1488_v36 = vpack.c.bf16 %v63_v33, %v62_v32  ;;  %v64_v37 = vld [vmem:[%s2302_s1 + $0x60] sm:$0xff]  ;;  %v38_v39 = vld [vmem:[%s2301_s0 + $0x90] sm:$0xff] }
  0x19   :  { %1481 = vmatprep.subr.bf16.mxu0 %v1480_v26  ;;  %v65_v38 = vld [vmem:[%s2302_s1 + $0x68] sm:$0xf]  ;;  %v39_v40 = vld [vmem:[%s2301_s0 + $0x98] sm:$0xff]  ;;  %v40_v42 = vld [vmem:[%s2301_s0 + $0xa0] sm:$0xff] }
  0x1a   :  { %417 = vrot.lane.b32.xlu0 %v1703_v24, %s1550_s25  ;;  %419 = vrot.lane.b32.xlu1 %v1708_v25, %s1550_s25  ;;  %v1492_v41 = vpack.c.bf16 %v65_v38, %v64_v37  ;;  %v41_v43 = vld [vmem:[%s2301_s0 + $0xa8] sm:$0xff]  ;;  %v42_v44 = vld [vmem:[%s2301_s0 + $0xb0] sm:$0xff] }
  0x1b   :  { %v43_v45 = vld [vmem:[%s2301_s0 + $0xb8] sm:$0xff]  ;;  %v44_v46 = vld [vmem:[%s2301_s0 + $0xc0] sm:$0xff]  ;;  %v45_v47 = vld [vmem:[%s2301_s0 + $0xc8] sm:$0xff] }
  0x1c   :  { %1483 = vmatpush3.bf16.msra.mxu0 %v1480_v26  ;;  %v46_v48 = vld [vmem:[%s2301_s0 + $0xd0] sm:$0xff]  ;;  %v47_v49 = vld [vmem:[%s2301_s0 + $0xd8] sm:$0xff]  ;;  %v48_v50 = vld [vmem:[%s2301_s0 + $0xe0] sm:$0xff] }
  0x1d   :  { %1485 = vmatprep.subr.bf16.mxu0 %v1484_v31  ;;  %v49_v51 = vld [vmem:[%s2301_s0 + $0xe8] sm:$0xff]  ;;  %v50_v52 = vld [vmem:[%s2301_s0 + $0xf0] sm:$0xff]  ;;  %v51_v53 = vld [vmem:[%s2301_s0 + $0xf8] sm:$0xff] }
  0x1e   :  { %421 = vrot.lane.b32.xlu0 %v1723_v29, %s1550_s25  ;;  %423 = vrot.lane.b32.xlu1 %v1728_v30, %s1550_s25 }
  0x20   :  { %1487 = vmatpush3.bf16.msra.mxu0 %v1484_v31 }
  0x21   :  { %1489 = vmatprep.subr.bf16.mxu0 %v1488_v36 }
  0x22   :  { %425 = vrot.lane.b32.xlu0 %v36_v34, %s1550_s25  ;;  %427 = vrot.lane.b32.xlu1 %v37_v35, %s1550_s25 }
  0x24   :  { %1491 = vmatpush3.bf16.msra.mxu0 %v1488_v36 }
  0x25   :  { %1494 = vmatprep.subr.msk.bf16.mxu0 %vm1493_vm3, %v1492_v41 }
  0x26   :  { %429 = vrot.lane.b32.xlu0 %v38_v39, %s1550_s25  ;;  %431 = vrot.lane.b32.xlu1 %v39_v40, %s1550_s25 }
  0x28   :  { %1497 = vmatpush3.bf16.msk.msra.mxu0 %vm1493_vm3, %v1492_v41 }
  0x2a   :  { %433 = vrot.lane.b32.xlu0 %v40_v42, %s1550_s25  ;;  %435 = vrot.lane.b32.xlu1 %v41_v43, %s1550_s25 }
  0x2b   :  { %1371 = vmatmul.mubr.msk.f32.vlgmr.msra.gmra.mrb[0].mxu0 %vm66_vm0, %v1603_v2 }
  0x2c   :  { %1373 = vmatprep.mubr.msk.f32.mxu0 %vm66_vm0, %v1595_v1 }
  0x2e   :  { %437 = vrot.lane.b32.xlu0 %v42_v44, %s1550_s25  ;;  %439 = vrot.lane.b32.xlu1 %v43_v45, %s1550_s25 }
  0x2f   :  { %1374 = vmatmul.mubr.msk.f32.gmra.mrb[2].mxu0 %vm66_vm0, %v1608_v3 }
  0x30   :  { %1376 = vmatprep.mubr.msk.f32.mxu0 %vm66_vm0, %v1618_v4 }
  0x32   :  { %441 = vrot.lane.b32.xlu0 %v44_v46, %s1550_s25  ;;  %443 = vrot.lane.b32.xlu1 %v45_v47, %s1550_s25 }
  0x33   :  { %1377 = vmatmul.mubr.msk.f32.gmra.mrb[4].mxu0 %vm66_vm0, %v1623_v5 }
  0x34   :  { %1379 = vmatprep.mubr.msk.f32.mxu0 %vm66_vm0, %v1632_v6 }
  0x36   :  { %445 = vrot.lane.b32.xlu0 %v46_v48, %s1550_s25  ;;  %447 = vrot.lane.b32.xlu1 %v47_v49, %s1550_s25 }
  0x37   :  { %1380 = vmatmul.mubr.msk.f32.gmra.mrb[6].mxu0 %vm66_vm0, %v1637_v7 }
  0x38   :  { %1382 = vmatprep.mubr.msk.f32.mxu0 %vm66_vm0, %v1658_v13 }
  0x3a   :  { %449 = vrot.lane.b32.xlu0 %v48_v50, %s1550_s25  ;;  %451 = vrot.lane.b32.xlu1 %v49_v51, %s1550_s25 }
  0x3b   :  { %1383 = vmatmul.mubr.msk.f32.gmra.mrb[8].mxu0 %vm66_vm0, %v1663_v14 }
  0x3c   :  { %1385 = vmatprep.mubr.msk.f32.mxu0 %vm66_vm0, %v1681_v19 }
  0x3e   :  { %453 = vrot.lane.b32.xlu0 %v50_v52, %s1550_s25  ;;  %455 = vrot.lane.b32.xlu1 %v51_v53, %s1550_s25 }
  0x3f   :  { %1386 = vmatmul.mubr.msk.f32.gmra.mrb[10].mxu0 %vm66_vm0, %v1686_v20 }
  0x40   :  { %1388 = vmatprep.mubr.msk.f32.mxu0 %vm66_vm0, %v1703_v24 }
  0x43   :  { %1389 = vmatmul.mubr.msk.f32.gmra.mrb[12].mxu0 %vm66_vm0, %v1708_v25 }
  0x44   :  { %1391 = vmatprep.mubr.msk.f32.mxu0 %vm66_vm0, %v1723_v29 }
  0x47   :  { %1392 = vmatmul.mubr.msk.f32.gmra.mrb[14].mxu0 %vm66_vm0, %v1728_v30 }
  0x48   :  { %1394 = vmatprep.mubr.msk.f32.mxu0 %vm66_vm0, %v36_v34 }
  0x4b   :  { %1395 = vmatmul.mubr.msk.f32.gmra.mrb[16].mxu0 %vm66_vm0, %v37_v35 }
  0x4c   :  { %1397 = vmatprep.mubr.msk.f32.mxu0 %vm66_vm0, %v38_v39 }
  0x4f   :  { %1398 = vmatmul.mubr.msk.f32.gmra.mrb[18].mxu0 %vm66_vm0, %v39_v40 }
  0x50   :  { %1400 = vmatprep.mubr.msk.f32.mxu0 %vm66_vm0, %v40_v42 }
  0x53   :  { %1401 = vmatmul.mubr.msk.f32.gmra.mrb[20].mxu0 %vm66_vm0, %v41_v43 }
  0x54   :  { %1403 = vmatprep.mubr.msk.f32.mxu0 %vm66_vm0, %v42_v44 }
  0x57   :  { %1404 = vmatmul.mubr.msk.f32.gmra.mrb[22].mxu0 %vm66_vm0, %v43_v45 }
  0x58   :  { %1406 = vmatprep.mubr.msk.f32.mxu0 %vm66_vm0, %v44_v46 }
  0x5b   :  { %1407 = vmatmul.mubr.msk.f32.gmra.mrb[24].mxu0 %vm66_vm0, %v45_v47 }
  0x5c   :  { %1409 = vmatprep.mubr.msk.f32.mxu0 %vm66_vm0, %v46_v48 }
  0x5f   :  { %1410 = vmatmul.mubr.msk.f32.gmra.mrb[26].mxu0 %vm66_vm0, %v47_v49 }
  0x60   :  { %1412 = vmatprep.mubr.msk.f32.mxu0 %vm66_vm0, %v48_v50 }
  0x63   :  { %1413 = vmatmul.mubr.msk.f32.gmra.mrb[28].mxu0 %vm66_vm0, %v49_v51 }
  0x64   :  { %1415 = vmatprep.mubr.msk.f32.mxu0 %vm66_vm0, %v50_v52 }
  0x67   :  { %1416 = vmatmul.mubr.msk.f32.gmra.mrb[30].mxu0 %vm66_vm0, %v51_v53 }
  0x74   :  { %v394_v54 = vpop.permute.xlu0 %393  ;;  %v398_v55 = vpop.permute.xlu1 %397 }
  0x75   :  { %1420 = vmatprep.mubr.msk.f32.mxu1 %vm457_vm4, %v394_v54 }
  0x78   :  { %v396_v56 = vpop.permute.xlu0 %395  ;;  %v400_v57 = vpop.permute.xlu1 %399 }
  0x79   :  { %1421 = vmatmul.mubr.msk.f32.vlgmr.msra.gmra.mrb[0].mxu1 %vm457_vm4, %v396_v56 }
  0x7a   :  { %1423 = vmatprep.mubr.msk.f32.mxu1 %vm457_vm4, %v398_v55 }
  0x7c   :  { %v402_v58 = vpop.permute.xlu0 %401  ;;  %v404_v59 = vpop.permute.xlu1 %403 }
  0x7d   :  { %1424 = vmatmul.mubr.msk.f32.gmra.mrb[2].mxu1 %vm457_vm4, %v400_v57 }
  0x7e   :  { %1426 = vmatprep.mubr.msk.f32.mxu1 %vm457_vm4, %v402_v58 }
  0x80   :  { %v406_v60 = vpop.permute.xlu0 %405  ;;  %v408_v61 = vpop.permute.xlu1 %407 }
  0x81   :  { %1427 = vmatmul.mubr.msk.f32.gmra.mrb[4].mxu1 %vm457_vm4, %v404_v59 }
  0x82   :  { %1429 = vmatprep.mubr.msk.f32.mxu1 %vm457_vm4, %v406_v60 }
  0x84   :  { %v410_v62 = vpop.permute.xlu0 %409  ;;  %v412_v63 = vpop.permute.xlu1 %411 }
  0x85   :  { %1430 = vmatmul.mubr.msk.f32.gmra.mrb[6].mxu1 %vm457_vm4, %v408_v61 }
  0x86   :  { %1432 = vmatprep.mubr.msk.f32.mxu1 %vm457_vm4, %v410_v62 }
  0x88   :  { %v414_v0 = vpop.permute.xlu0 %413  ;;  %v416_v1 = vpop.permute.xlu1 %415 }
  0x89   :  { %1433 = vmatmul.mubr.msk.f32.gmra.mrb[8].mxu1 %vm457_vm4, %v412_v63 }
  0x8a   :  { %1435 = vmatprep.mubr.msk.f32.mxu1 %vm457_vm4, %v414_v0 }
  0x8c   :  { %v418_v2 = vpop.permute.xlu0 %417  ;;  %v420_v3 = vpop.permute.xlu1 %419 }
  0x8d   :  { %1436 = vmatmul.mubr.msk.f32.gmra.mrb[10].mxu1 %vm457_vm4, %v416_v1 }
  0x8e   :  { %1438 = vmatprep.mubr.msk.f32.mxu1 %vm457_vm4, %v418_v2 }
  0x90   :  { %v422_v4 = vpop.permute.xlu0 %421  ;;  %v424_v5 = vpop.permute.xlu1 %423 }
  0x91   :  { %1439 = vmatmul.mubr.msk.f32.gmra.mrb[12].mxu1 %vm457_vm4, %v420_v3 }
  0x92   :  { %1441 = vmatprep.mubr.msk.f32.mxu1 %vm457_vm4, %v422_v4 }
  0x94   :  { %v426_v6 = vpop.permute.xlu0 %425  ;;  %v428_v7 = vpop.permute.xlu1 %427 }
  0x95   :  { %1442 = vmatmul.mubr.msk.f32.gmra.mrb[14].mxu1 %vm457_vm4, %v424_v5 }
  0x96   :  { %1444 = vmatprep.mubr.msk.f32.mxu1 %vm457_vm4, %v426_v6 }
  0x98   :  { %v430_v8 = vpop.permute.xlu0 %429  ;;  %v432_v9 = vpop.permute.xlu1 %431 }
  0x99   :  { %1445 = vmatmul.mubr.msk.f32.gmra.mrb[16].mxu1 %vm457_vm4, %v428_v7 }
  0x9a   :  { %1447 = vmatprep.mubr.msk.f32.mxu1 %vm457_vm4, %v430_v8 }
  0x9c   :  { %v434_v10 = vpop.permute.xlu0 %433  ;;  %v436_v11 = vpop.permute.xlu1 %435 }
  0x9d   :  { %1448 = vmatmul.mubr.msk.f32.gmra.mrb[18].mxu1 %vm457_vm4, %v432_v9 }
  0x9e   :  { %1450 = vmatprep.mubr.msk.f32.mxu1 %vm457_vm4, %v434_v10 }
  0xa0   :  { %v438_v12 = vpop.permute.xlu0 %437  ;;  %v440_v13 = vpop.permute.xlu1 %439 }
  0xa1   :  { %1451 = vmatmul.mubr.msk.f32.gmra.mrb[20].mxu1 %vm457_vm4, %v436_v11 }
  0xa2   :  { %1453 = vmatprep.mubr.msk.f32.mxu1 %vm457_vm4, %v438_v12 }
  0xa4   :  { %v442_v14 = vpop.permute.xlu0 %441  ;;  %v444_v15 = vpop.permute.xlu1 %443 }
  0xa5   :  { %1454 = vmatmul.mubr.msk.f32.gmra.mrb[22].mxu1 %vm457_vm4, %v440_v13 }
  0xa6   :  { %1456 = vmatprep.mubr.msk.f32.mxu1 %vm457_vm4, %v442_v14 }
  0xa8   :  { %v446_v16 = vpop.permute.xlu0 %445  ;;  %v448_v17 = vpop.permute.xlu1 %447 }
  0xa9   :  { %1457 = vmatmul.mubr.msk.f32.gmra.mrb[24].mxu1 %vm457_vm4, %v444_v15 }
  0xaa   :  { %1459 = vmatprep.mubr.msk.f32.mxu1 %vm457_vm4, %v446_v16 }
  0xac   :  { %v450_v18 = vpop.permute.xlu0 %449  ;;  %v452_v19 = vpop.permute.xlu1 %451 }
  0xad   :  { %1460 = vmatmul.mubr.msk.f32.gmra.mrb[26].mxu1 %vm457_vm4, %v448_v17 }
  0xae   :  { %1462 = vmatprep.mubr.msk.f32.mxu1 %vm457_vm4, %v450_v18 }
  0xb0   :  { %v454_v20 = vpop.permute.xlu0 %453  ;;  %v456_v21 = vpop.permute.xlu1 %455 }
  0xb1   :  { %1463 = vmatmul.mubr.msk.f32.gmra.mrb[28].mxu1 %vm457_vm4, %v452_v19 }
  0xb2   :  { %1465 = vmatprep.mubr.msk.f32.mxu1 %vm457_vm4, %v454_v20 }
  0xb5   :  { %1466 = vmatmul.mubr.msk.f32.gmra.mrb[30].mxu1 %vm457_vm4, %v456_v21 }
  0xfe   :  { %v1372_v22 = vpop.f32.mrb[0].mxu0 }
  0xff   :  { %752 = vst.msk [vmem:[%s2304_s3 + $0x8] sm:$0xff] %vm750_vm5, %v1372_v22  ;;  %v816_v23 = vsel %vm750_vm5, %v1372_v22, 0.0  ;;  %v885_v24 = vmul.f32 %v1372_v22, %v1372_v22  ;;  %v233_v25 = vpop.f32.mrb[1].mxu0 }
 0x100   :  { %751 = vst.msk [vmem:[%s2304_s3] sm:$0xff] %vm750_vm5, %v233_v25  ;;  %v815_v26 = vsel %vm750_vm5, %v233_v25, 0.0  ;;  %v884_v27 = vmul.f32 %v233_v25, %v233_v25 }
 0x101   :  { %v917_v28 = vsel %vm750_vm5, %v885_v24, 0.0  ;;  %v817_v29 = vadd.f32 %v816_v23, %v815_v26 }
 0x102   :  { %v916_v30 = vsel %vm750_vm5, %v884_v27, 0.0  ;;  %v1375_v31 = vpop.f32.mrb[2].mxu0 }
 0x103   :  { %v918_v32 = vadd.f32 %v917_v28, %v916_v30  ;;  %754 = vst.msk [vmem:[%s2304_s3 + $0x18] sm:$0xff] %vm750_vm5, %v1375_v31  ;;  %v887_v33 = vmul.f32 %v1375_v31, %v1375_v31  ;;  %v243_v34 = vpop.f32.mrb[3].mxu0  ;;  %v820_v35 = vsel %vm750_vm5, %v1375_v31, 0.0 }
 0x104   :  { %753 = vst.msk [vmem:[%s2304_s3 + $0x10] sm:$0xff] %vm750_vm5, %v243_v34  ;;  %v818_v36 = vsel %vm750_vm5, %v243_v34, 0.0  ;;  %v886_v37 = vmul.f32 %v243_v34, %v243_v34 }
 0x105   :  { %v819_v38 = vadd.f32 %v818_v36, %v817_v29  ;;  %v921_v39 = vsel %vm750_vm5, %v887_v33, 0.0 }
 0x106   :  { %v919_v40 = vsel %vm750_vm5, %v886_v37, 0.0  ;;  %v1378_v41 = vpop.f32.mrb[4].mxu0 }
 0x107   :  { %v920_v42 = vadd.f32 %v919_v40, %v918_v32  ;;  %756 = vst.msk [vmem:[%s2304_s3 + $0x28] sm:$0xff] %vm750_vm5, %v1378_v41  ;;  %v889_v43 = vmul.f32 %v1378_v41, %v1378_v41  ;;  %v253_v44 = vpop.f32.mrb[5].mxu0  ;;  %v821_v45 = vadd.f32 %v820_v35, %v819_v38  ;;  %v824_v46 = vsel %vm750_vm5, %v1378_v41, 0.0 }
 0x108   :  { %755 = vst.msk [vmem:[%s2304_s3 + $0x20] sm:$0xff] %vm750_vm5, %v253_v44  ;;  %v822_v47 = vsel %vm750_vm5, %v253_v44, 0.0  ;;  %v888_v48 = vmul.f32 %v253_v44, %v253_v44 }
 0x109   :  { %v823_v49 = vadd.f32 %v822_v47, %v821_v45  ;;  %v922_v50 = vadd.f32 %v921_v39, %v920_v42  ;;  %v925_v51 = vsel %vm750_vm5, %v889_v43, 0.0 }
 0x10a   :  { %v923_v52 = vsel %vm750_vm5, %v888_v48, 0.0  ;;  %v1381_v53 = vpop.f32.mrb[6].mxu0 }
 0x10b   :  { %v924_v54 = vadd.f32 %v923_v52, %v922_v50  ;;  %758 = vst.msk [vmem:[%s2304_s3 + $0x38] sm:$0xff] %vm750_vm5, %v1381_v53  ;;  %v891_v55 = vmul.f32 %v1381_v53, %v1381_v53  ;;  %v263_v56 = vpop.f32.mrb[7].mxu0  ;;  %v825_v57 = vadd.f32 %v824_v46, %v823_v49  ;;  %v828_v58 = vsel %vm750_vm5, %v1381_v53, 0.0 }
 0x10c   :  { %757 = vst.msk [vmem:[%s2304_s3 + $0x30] sm:$0xff] %vm750_vm5, %v263_v56  ;;  %v826_v59 = vsel %vm750_vm5, %v263_v56, 0.0  ;;  %v890_v60 = vmul.f32 %v263_v56, %v263_v56 }
 0x10d   :  { %v827_v61 = vadd.f32 %v826_v59, %v825_v57  ;;  %v926_v62 = vadd.f32 %v925_v51, %v924_v54  ;;  %v929_v63 = vsel %vm750_vm5, %v891_v55, 0.0 }
 0x10e   :  { %v927_v0 = vsel %vm750_vm5, %v890_v60, 0.0  ;;  %v1384_v1 = vpop.f32.mrb[8].mxu0 }
 0x10f   :  { %v928_v2 = vadd.f32 %v927_v0, %v926_v62  ;;  %760 = vst.msk [vmem:[%s2304_s3 + $0x48] sm:$0xff] %vm750_vm5, %v1384_v1  ;;  %v893_v3 = vmul.f32 %v1384_v1, %v1384_v1  ;;  %v273_v4 = vpop.f32.mrb[9].mxu0  ;;  %v829_v5 = vadd.f32 %v828_v58, %v827_v61  ;;  %v832_v6 = vsel %vm750_vm5, %v1384_v1, 0.0 }
 0x110   :  { %759 = vst.msk [vmem:[%s2304_s3 + $0x40] sm:$0xff] %vm750_vm5, %v273_v4  ;;  %v830_v7 = vsel %vm750_vm5, %v273_v4, 0.0  ;;  %v892_v8 = vmul.f32 %v273_v4, %v273_v4 }
 0x111   :  { %v831_v9 = vadd.f32 %v830_v7, %v829_v5  ;;  %v930_v10 = vadd.f32 %v929_v63, %v928_v2  ;;  %v933_v11 = vsel %vm750_vm5, %v893_v3, 0.0 }
 0x112   :  { %v931_v12 = vsel %vm750_vm5, %v892_v8, 0.0  ;;  %v1387_v13 = vpop.f32.mrb[10].mxu0 }
 0x113   :  { %v932_v14 = vadd.f32 %v931_v12, %v930_v10  ;;  %762 = vst.msk [vmem:[%s2304_s3 + $0x58] sm:$0xff] %vm750_vm5, %v1387_v13  ;;  %v895_v15 = vmul.f32 %v1387_v13, %v1387_v13  ;;  %v283_v16 = vpop.f32.mrb[11].mxu0  ;;  %v833_v17 = vadd.f32 %v832_v6, %v831_v9  ;;  %v836_v18 = vsel %vm750_vm5, %v1387_v13, 0.0 }
 0x114   :  { %761 = vst.msk [vmem:[%s2304_s3 + $0x50] sm:$0xff] %vm750_vm5, %v283_v16  ;;  %v834_v19 = vsel %vm750_vm5, %v283_v16, 0.0  ;;  %v894_v20 = vmul.f32 %v283_v16, %v283_v16 }
 0x115   :  { %v835_v21 = vadd.f32 %v834_v19, %v833_v17  ;;  %v934_v22 = vadd.f32 %v933_v11, %v932_v14  ;;  %v937_v23 = vsel %vm750_vm5, %v895_v15, 0.0 }
 0x116   :  { %v935_v24 = vsel %vm750_vm5, %v894_v20, 0.0  ;;  %v1390_v25 = vpop.f32.mrb[12].mxu0 }
 0x117   :  { %v936_v26 = vadd.f32 %v935_v24, %v934_v22  ;;  %764 = vst.msk [vmem:[%s2304_s3 + $0x68] sm:$0xff] %vm750_vm5, %v1390_v25  ;;  %v897_v27 = vmul.f32 %v1390_v25, %v1390_v25  ;;  %v293_v28 = vpop.f32.mrb[13].mxu0  ;;  %v837_v29 = vadd.f32 %v836_v18, %v835_v21  ;;  %v840_v30 = vsel %vm750_vm5, %v1390_v25, 0.0 }
 0x118   :  { %763 = vst.msk [vmem:[%s2304_s3 + $0x60] sm:$0xff] %vm750_vm5, %v293_v28  ;;  %v838_v31 = vsel %vm750_vm5, %v293_v28, 0.0  ;;  %v896_v32 = vmul.f32 %v293_v28, %v293_v28 }
 0x119   :  { %v839_v33 = vadd.f32 %v838_v31, %v837_v29  ;;  %v938_v34 = vadd.f32 %v937_v23, %v936_v26  ;;  %v941_v35 = vsel %vm750_vm5, %v897_v27, 0.0 }
 0x11a   :  { %v939_v36 = vsel %vm750_vm5, %v896_v32, 0.0  ;;  %v1393_v37 = vpop.f32.mrb[14].mxu0 }
 0x11b   :  { %v940_v38 = vadd.f32 %v939_v36, %v938_v34  ;;  %766 = vst.msk [vmem:[%s2304_s3 + $0x78] sm:$0xff] %vm750_vm5, %v1393_v37  ;;  %v899_v39 = vmul.f32 %v1393_v37, %v1393_v37  ;;  %v303_v40 = vpop.f32.mrb[15].mxu0  ;;  %v841_v41 = vadd.f32 %v840_v30, %v839_v33  ;;  %v844_v42 = vsel %vm750_vm5, %v1393_v37, 0.0 }
 0x11c   :  { %765 = vst.msk [vmem:[%s2304_s3 + $0x70] sm:$0xff] %vm750_vm5, %v303_v40  ;;  %v842_v43 = vsel %vm750_vm5, %v303_v40, 0.0  ;;  %v898_v44 = vmul.f32 %v303_v40, %v303_v40 }
 0x11d   :  { %v843_v45 = vadd.f32 %v842_v43, %v841_v41  ;;  %v942_v46 = vadd.f32 %v941_v35, %v940_v38  ;;  %v945_v47 = vsel %vm750_vm5, %v899_v39, 0.0 }
 0x11e   :  { %v943_v48 = vsel %vm750_vm5, %v898_v44, 0.0  ;;  %v1396_v49 = vpop.f32.mrb[16].mxu0 }
 0x11f   :  { %v944_v50 = vadd.f32 %v943_v48, %v942_v46  ;;  %768 = vst.msk [vmem:[%s2304_s3 + $0x88] sm:$0xff] %vm750_vm5, %v1396_v49  ;;  %v901_v51 = vmul.f32 %v1396_v49, %v1396_v49  ;;  %v313_v52 = vpop.f32.mrb[17].mxu0  ;;  %v845_v53 = vadd.f32 %v844_v42, %v843_v45  ;;  %v848_v54 = vsel %vm750_vm5, %v1396_v49, 0.0 }
 0x120   :  { %767 = vst.msk [vmem:[%s2304_s3 + $0x80] sm:$0xff] %vm750_vm5, %v313_v52  ;;  %v846_v55 = vsel %vm750_vm5, %v313_v52, 0.0  ;;  %v900_v56 = vmul.f32 %v313_v52, %v313_v52 }
 0x121   :  { %v847_v57 = vadd.f32 %v846_v55, %v845_v53  ;;  %v946_v58 = vadd.f32 %v945_v47, %v944_v50  ;;  %v949_v59 = vsel %vm750_vm5, %v901_v51, 0.0 }
 0x122   :  { %v947_v60 = vsel %vm750_vm5, %v900_v56, 0.0  ;;  %v1399_v61 = vpop.f32.mrb[18].mxu0 }
 0x123   :  { %v948_v62 = vadd.f32 %v947_v60, %v946_v58  ;;  %770 = vst.msk [vmem:[%s2304_s3 + $0x98] sm:$0xff] %vm750_vm5, %v1399_v61  ;;  %v903_v63 = vmul.f32 %v1399_v61, %v1399_v61  ;;  %v323_v0 = vpop.f32.mrb[19].mxu0  ;;  %v849_v1 = vadd.f32 %v848_v54, %v847_v57  ;;  %v852_v2 = vsel %vm750_vm5, %v1399_v61, 0.0 }
 0x124   :  { %769 = vst.msk [vmem:[%s2304_s3 + $0x90] sm:$0xff] %vm750_vm5, %v323_v0  ;;  %v850_v3 = vsel %vm750_vm5, %v323_v0, 0.0  ;;  %v902_v4 = vmul.f32 %v323_v0, %v323_v0 }
 0x125   :  { %v851_v5 = vadd.f32 %v850_v3, %v849_v1  ;;  %v950_v6 = vadd.f32 %v949_v59, %v948_v62  ;;  %v953_v7 = vsel %vm750_vm5, %v903_v63, 0.0 }
 0x126   :  { %v951_v8 = vsel %vm750_vm5, %v902_v4, 0.0  ;;  %v1402_v9 = vpop.f32.mrb[20].mxu0 }
 0x127   :  { %v952_v10 = vadd.f32 %v951_v8, %v950_v6  ;;  %772 = vst.msk [vmem:[%s2304_s3 + $0xa8] sm:$0xff] %vm750_vm5, %v1402_v9  ;;  %v905_v11 = vmul.f32 %v1402_v9, %v1402_v9  ;;  %v333_v12 = vpop.f32.mrb[21].mxu0  ;;  %v853_v13 = vadd.f32 %v852_v2, %v851_v5  ;;  %v856_v14 = vsel %vm750_vm5, %v1402_v9, 0.0 }
 0x128   :  { %771 = vst.msk [vmem:[%s2304_s3 + $0xa0] sm:$0xff] %vm750_vm5, %v333_v12  ;;  %v854_v15 = vsel %vm750_vm5, %v333_v12, 0.0  ;;  %v904_v16 = vmul.f32 %v333_v12, %v333_v12 }
 0x129   :  { %v855_v17 = vadd.f32 %v854_v15, %v853_v13  ;;  %v954_v18 = vadd.f32 %v953_v7, %v952_v10  ;;  %v957_v19 = vsel %vm750_vm5, %v905_v11, 0.0 }
 0x12a   :  { %v955_v20 = vsel %vm750_vm5, %v904_v16, 0.0  ;;  %v1405_v21 = vpop.f32.mrb[22].mxu0 }
 0x12b   :  { %v956_v22 = vadd.f32 %v955_v20, %v954_v18  ;;  %774 = vst.msk [vmem:[%s2304_s3 + $0xb8] sm:$0xff] %vm750_vm5, %v1405_v21  ;;  %v907_v23 = vmul.f32 %v1405_v21, %v1405_v21  ;;  %v343_v24 = vpop.f32.mrb[23].mxu0  ;;  %v857_v25 = vadd.f32 %v856_v14, %v855_v17  ;;  %v860_v26 = vsel %vm750_vm5, %v1405_v21, 0.0 }
 0x12c   :  { %773 = vst.msk [vmem:[%s2304_s3 + $0xb0] sm:$0xff] %vm750_vm5, %v343_v24  ;;  %v858_v27 = vsel %vm750_vm5, %v343_v24, 0.0  ;;  %v906_v28 = vmul.f32 %v343_v24, %v343_v24 }
 0x12d   :  { %v859_v29 = vadd.f32 %v858_v27, %v857_v25  ;;  %v958_v30 = vadd.f32 %v957_v19, %v956_v22  ;;  %v961_v31 = vsel %vm750_vm5, %v907_v23, 0.0 }
 0x12e   :  { %v959_v32 = vsel %vm750_vm5, %v906_v28, 0.0  ;;  %v1408_v33 = vpop.f32.mrb[24].mxu0 }
 0x12f   :  { %v960_v34 = vadd.f32 %v959_v32, %v958_v30  ;;  %776 = vst.msk [vmem:[%s2304_s3 + $0xc8] sm:$0xff] %vm750_vm5, %v1408_v33  ;;  %v909_v35 = vmul.f32 %v1408_v33, %v1408_v33  ;;  %v353_v36 = vpop.f32.mrb[25].mxu0  ;;  %v861_v37 = vadd.f32 %v860_v26, %v859_v29  ;;  %v864_v38 = vsel %vm750_vm5, %v1408_v33, 0.0 }
 0x130   :  { %775 = vst.msk [vmem:[%s2304_s3 + $0xc0] sm:$0xff] %vm750_vm5, %v353_v36  ;;  %v862_v39 = vsel %vm750_vm5, %v353_v36, 0.0  ;;  %v908_v40 = vmul.f32 %v353_v36, %v353_v36 }
 0x131   :  { %v863_v41 = vadd.f32 %v862_v39, %v861_v37  ;;  %v962_v42 = vadd.f32 %v961_v31, %v960_v34  ;;  %v965_v43 = vsel %vm750_vm5, %v909_v35, 0.0 }
 0x132   :  { %v963_v44 = vsel %vm750_vm5, %v908_v40, 0.0  ;;  %v1411_v45 = vpop.f32.mrb[26].mxu0 }
 0x133   :  { %v964_v46 = vadd.f32 %v963_v44, %v962_v42  ;;  %778 = vst.msk [vmem:[%s2304_s3 + $0xd8] sm:$0xff] %vm750_vm5, %v1411_v45  ;;  %v911_v47 = vmul.f32 %v1411_v45, %v1411_v45  ;;  %v363_v48 = vpop.f32.mrb[27].mxu0  ;;  %v865_v49 = vadd.f32 %v864_v38, %v863_v41  ;;  %v868_v50 = vsel %vm750_vm5, %v1411_v45, 0.0 }
 0x134   :  { %777 = vst.msk [vmem:[%s2304_s3 + $0xd0] sm:$0xff] %vm750_vm5, %v363_v48  ;;  %v866_v51 = vsel %vm750_vm5, %v363_v48, 0.0  ;;  %v910_v52 = vmul.f32 %v363_v48, %v363_v48 }
 0x135   :  { %v867_v53 = vadd.f32 %v866_v51, %v865_v49  ;;  %v966_v54 = vadd.f32 %v965_v43, %v964_v46  ;;  %v969_v55 = vsel %vm750_vm5, %v911_v47, 0.0 }
 0x136   :  { %v967_v56 = vsel %vm750_vm5, %v910_v52, 0.0  ;;  %v1414_v57 = vpop.f32.mrb[28].mxu0 }
 0x137   :  { %v968_v58 = vadd.f32 %v967_v56, %v966_v54  ;;  %780 = vst.msk [vmem:[%s2304_s3 + $0xe8] sm:$0xff] %vm750_vm5, %v1414_v57  ;;  %v913_v59 = vmul.f32 %v1414_v57, %v1414_v57  ;;  %v373_v60 = vpop.f32.mrb[29].mxu0  ;;  %v869_v61 = vadd.f32 %v868_v50, %v867_v53  ;;  %v872_v62 = vsel %vm750_vm5, %v1414_v57, 0.0 }
 0x138   :  { %779 = vst.msk [vmem:[%s2304_s3 + $0xe0] sm:$0xff] %vm750_vm5, %v373_v60  ;;  %v870_v63 = vsel %vm750_vm5, %v373_v60, 0.0  ;;  %v912_v0 = vmul.f32 %v373_v60, %v373_v60 }
 0x139   :  { %v871_v1 = vadd.f32 %v870_v63, %v869_v61  ;;  %v970_v2 = vadd.f32 %v969_v55, %v968_v58  ;;  %v973_v3 = vsel %vm750_vm5, %v913_v59, 0.0 }
 0x13a   :  { %v971_v4 = vsel %vm750_vm5, %v912_v0, 0.0  ;;  %v1417_v5 = vpop.f32.mrb[30].mxu0 }
 0x13b   :  { %v972_v6 = vadd.f32 %v971_v4, %v970_v2  ;;  %782 = vst.msk [vmem:[%s2304_s3 + $0xf8] sm:$0xff] %vm750_vm5, %v1417_v5  ;;  %v915_v7 = vmul.f32 %v1417_v5, %v1417_v5  ;;  %v383_v8 = vpop.f32.mrb[31].mxu0  ;;  %v873_v9 = vadd.f32 %v872_v62, %v871_v1  ;;  %v876_v10 = vsel %vm750_vm5, %v1417_v5, 0.0 }
 0x13c   :  { %781 = vst.msk [vmem:[%s2304_s3 + $0xf0] sm:$0xff] %vm750_vm5, %v383_v8  ;;  %v874_v11 = vsel %vm750_vm5, %v383_v8, 0.0  ;;  %v914_v12 = vmul.f32 %v383_v8, %v383_v8  ;;  %s1552_s3 = smov [#allocation2]  }
 0x13d   :  { %v875_v13 = vadd.f32 %v874_v11, %v873_v9  ;;  %v974_v14 = vadd.f32 %v973_v3, %v972_v6  ;;  %v977_v15 = vsel %vm750_vm5, %v915_v7, 0.0  ;;  %s1171_s27 = sshll.u32 %s1552_s3, 4  ;;  %s1172_s27 = int_to_ptr.vmem [resolvable:$true] %s1171_s27 }
 0x13e   :  { %v975_v16 = vsel %vm750_vm5, %v914_v12, 0.0  ;;  %s1502_s12 = scalar_lea.vmem %s1172_s27, 32  ;;  %p1507_p1 = scmp.lt.s32.totalorder %s1172_s27, %s1172_s27 }
 0x13f   :  { %v877_v17 = vadd.f32 %v876_v10, %v875_v13  ;;  %v976_v18 = vadd.f32 %v975_v16, %v974_v14  ;;  %p1503_p0 = scmp.ne.s32.totalorder %s1172_s27, %s1502_s12  ;;  %p1508_p2 = scmp.lt.s32.totalorder %s1502_s12, %s1502_s12 }
 0x141   :  { %v878_v19 = vrot.slane %v877_v17, 4  ;;  %v978_v20 = vadd.f32 %v977_v15, %v976_v18  ;;  %p1509_p3 = por %p1508_p2, %p1507_p1 }
 0x143   :  { %v879_v21 = vadd.f32 %v878_v19, %v877_v17  ;;  %v979_v22 = vrot.slane %v978_v20, 4  ;;  %p1510_p4 = pnand %p1509_p3, %p1503_p0 }
 0x145   :  { %v880_v23 = vrot.slane %v879_v21, 2  ;;  %v980_v24 = vadd.f32 %v979_v22, %v978_v20 }
 0x147   :  { %v881_v25 = vadd.f32 %v880_v23, %v879_v21  ;;  %v981_v26 = vrot.slane %v980_v24, 2 }
 0x149   :  { %v882_v27 = vrot.slane %v881_v25, 1  ;;  %v982_v28 = vadd.f32 %v981_v26, %v980_v24 }
 0x14b   :  { %v883_v30 = vadd.f32 %v882_v27, %v881_v25  ;;  %v983_v31 = vrot.slane %v982_v28, 1 }
 0x14c   :  { %v1422_v29 = vpop.f32.mrb[0].mxu1 }
 0x14d   :  { %784 = vst.msk [vmem:[%s2305_s4 + $0x8] sm:$0xff] %vm750_vm5, %v1422_v29  ;;  %v990_v32 = vsel %vm750_vm5, %v1422_v29, 0.0  ;;  %v1059_v33 = vmul.f32 %v1422_v29, %v1422_v29  ;;  %v591_v34 = vpop.f32.mrb[1].mxu1  ;;  %v984_v37 = vadd.f32 %v983_v31, %v982_v28 }
 0x14e   :  { %783 = vst.msk [vmem:[%s2305_s4] sm:$0xff] %vm750_vm5, %v591_v34  ;;  %v989_v35 = vsel %vm750_vm5, %v591_v34, 0.0  ;;  %v1058_v36 = vmul.f32 %v591_v34, %v591_v34 }
 0x14f   :  { %v1091_v38 = vsel %vm750_vm5, %v1059_v33, 0.0  ;;  %v991_v39 = vadd.f32 %v990_v32, %v989_v35  ;;  %v986_v42 = vsel %vm985_vm6, %v883_v30, %v984_v37 }
 0x150   :  { %v1090_v40 = vsel %vm750_vm5, %v1058_v36, 0.0  ;;  %v1425_v41 = vpop.f32.mrb[2].mxu1  ;;  %988 = vst.msk [vmem:[#allocation2] sm:$0x3] %vm987_vm7, %v986_v42 }
 0x151   :  { %v1092_v43 = vadd.f32 %v1091_v38, %v1090_v40  ;;  %786 = vst.msk [vmem:[%s2305_s4 + $0x18] sm:$0xff] %vm750_vm5, %v1425_v41  ;;  %v601_v44 = vpop.f32.mrb[3].mxu1  ;;  %v1061_v45 = vmul.f32 %v1425_v41, %v1425_v41 }
 0x152   :  { %785 = vst.msk [vmem:[%s2305_s4 + $0x10] sm:$0xff] %vm750_vm5, %v601_v44  ;;  %v992_v46 = vsel %vm750_vm5, %v601_v44, 0.0  ;;  %v1060_v47 = vmul.f32 %v601_v44, %v601_v44 }
 0x153   :  { %1513 = shalt.err (!%p1510_p4)
}
 0x154   :  { %s1514_s14 = scalar_lea.hbm %s2306_s5, 32 }
 0x155   :  { %p1515_p5 = scmp.ne.s32.totalorder %s2306_s5, %s1514_s14  ;;  %p1518_p6 = scmp.lt.u32.totalorder %s1514_s14, %s2306_s5 }
 0x157   :  { %p1520_p7 = pnand %p1518_p6, %p1515_p5 }
 0x159   :  { %1523 = shalt.err (!%p1520_p7)
}
 0x15a   :  { %1174 = dma.vmem_to_hbm [thread:$0]  %s1172_s27, 32, %s2306_s5, [#allocation3]   ;;  %v993_v48 = vadd.f32 %v992_v46, %v991_v39  ;;  %v994_v49 = vsel %vm750_vm5, %v1425_v41, 0.0  ;;  %v1093_v50 = vsel %vm750_vm5, %v1060_v47, 0.0  ;;  %v1428_v51 = vpop.f32.mrb[4].mxu1  ;;  %v1095_v55 = vsel %vm750_vm5, %v1061_v45, 0.0 }
 0x15b   :  { %v1094_v52 = vadd.f32 %v1093_v50, %v1092_v43  ;;  %788 = vst.msk [vmem:[%s2305_s4 + $0x28] sm:$0xff] %vm750_vm5, %v1428_v51  ;;  %v611_v53 = vpop.f32.mrb[5].mxu1  ;;  %v1063_v56 = vmul.f32 %v1428_v51, %v1428_v51  ;;  %v998_v61 = vsel %vm750_vm5, %v1428_v51, 0.0 }
 0x15c   :  { %v995_v54 = vadd.f32 %v994_v49, %v993_v48  ;;  %787 = vst.msk [vmem:[%s2305_s4 + $0x20] sm:$0xff] %vm750_vm5, %v611_v53  ;;  %v996_v57 = vsel %vm750_vm5, %v611_v53, 0.0  ;;  %v1062_v58 = vmul.f32 %v611_v53, %v611_v53  ;;  %v1431_v63 = vpop.f32.mrb[6].mxu1 }
 0x15d   :  { %v1096_v60 = vadd.f32 %v1095_v55, %v1094_v52  ;;  %790 = vst.msk [vmem:[%s2305_s4 + $0x38] sm:$0xff] %vm750_vm5, %v1431_v63  ;;  %v621_v1 = vpop.f32.mrb[7].mxu1  ;;  %v1099_v3 = vsel %vm750_vm5, %v1063_v56, 0.0  ;;  %v1065_v4 = vmul.f32 %v1431_v63, %v1431_v63  ;;  %v1002_v9 = vsel %vm750_vm5, %v1431_v63, 0.0 }
 0x15e   :  { %v997_v59 = vadd.f32 %v996_v57, %v995_v54  ;;  %v1097_v62 = vsel %vm750_vm5, %v1062_v58, 0.0  ;;  %789 = vst.msk [vmem:[%s2305_s4 + $0x30] sm:$0xff] %vm750_vm5, %v621_v1  ;;  %v1000_v5 = vsel %vm750_vm5, %v621_v1, 0.0  ;;  %v1064_v6 = vmul.f32 %v621_v1, %v621_v1  ;;  %v1434_v11 = vpop.f32.mrb[8].mxu1 }
 0x15f   :  { %v1098_v0 = vadd.f32 %v1097_v62, %v1096_v60  ;;  %792 = vst.msk [vmem:[%s2305_s4 + $0x48] sm:$0xff] %vm750_vm5, %v1434_v11  ;;  %v631_v13 = vpop.f32.mrb[9].mxu1  ;;  %v1103_v15 = vsel %vm750_vm5, %v1065_v4, 0.0  ;;  %v1067_v16 = vmul.f32 %v1434_v11, %v1434_v11  ;;  %v1006_v21 = vsel %vm750_vm5, %v1434_v11, 0.0 }
 0x160   :  { %v999_v2 = vadd.f32 %v998_v61, %v997_v59  ;;  %v1101_v10 = vsel %vm750_vm5, %v1064_v6, 0.0  ;;  %791 = vst.msk [vmem:[%s2305_s4 + $0x40] sm:$0xff] %vm750_vm5, %v631_v13  ;;  %v1004_v17 = vsel %vm750_vm5, %v631_v13, 0.0  ;;  %v1066_v18 = vmul.f32 %v631_v13, %v631_v13  ;;  %v1437_v23 = vpop.f32.mrb[10].mxu1 }
 0x161   :  { %v1100_v8 = vadd.f32 %v1099_v3, %v1098_v0  ;;  %794 = vst.msk [vmem:[%s2305_s4 + $0x58] sm:$0xff] %vm750_vm5, %v1437_v23  ;;  %v641_v25 = vpop.f32.mrb[11].mxu1  ;;  %v1107_v27 = vsel %vm750_vm5, %v1067_v16, 0.0  ;;  %v1069_v28 = vmul.f32 %v1437_v23, %v1437_v23  ;;  %v1010_v33 = vsel %vm750_vm5, %v1437_v23, 0.0 }
 0x162   :  { %v1001_v7 = vadd.f32 %v1000_v5, %v999_v2  ;;  %v1105_v22 = vsel %vm750_vm5, %v1066_v18, 0.0  ;;  %793 = vst.msk [vmem:[%s2305_s4 + $0x50] sm:$0xff] %vm750_vm5, %v641_v25  ;;  %v1008_v29 = vsel %vm750_vm5, %v641_v25, 0.0  ;;  %v1068_v30 = vmul.f32 %v641_v25, %v641_v25 }
 0x163   :  { %v1102_v12 = vadd.f32 %v1101_v10, %v1100_v8  ;;  %v1111_v39 = vsel %vm750_vm5, %v1069_v28, 0.0 }
 0x164   :  { %v1003_v14 = vadd.f32 %v1002_v9, %v1001_v7  ;;  %v1109_v34 = vsel %vm750_vm5, %v1068_v30, 0.0  ;;  %v1440_v35 = vpop.f32.mrb[12].mxu1 }
 0x165   :  { %v1104_v20 = vadd.f32 %v1103_v15, %v1102_v12  ;;  %796 = vst.msk [vmem:[%s2305_s4 + $0x68] sm:$0xff] %vm750_vm5, %v1440_v35  ;;  %v651_v37 = vpop.f32.mrb[13].mxu1  ;;  %v1071_v40 = vmul.f32 %v1440_v35, %v1440_v35  ;;  %v1014_v45 = vsel %vm750_vm5, %v1440_v35, 0.0 }
 0x166   :  { %v1005_v19 = vadd.f32 %v1004_v17, %v1003_v14  ;;  %795 = vst.msk [vmem:[%s2305_s4 + $0x60] sm:$0xff] %vm750_vm5, %v651_v37  ;;  %v1012_v41 = vsel %vm750_vm5, %v651_v37, 0.0  ;;  %v1070_v42 = vmul.f32 %v651_v37, %v651_v37 }
 0x167   :  { %v1106_v24 = vadd.f32 %v1105_v22, %v1104_v20  ;;  %v1115_v51 = vsel %vm750_vm5, %v1071_v40, 0.0 }
 0x168   :  { %v1007_v26 = vadd.f32 %v1006_v21, %v1005_v19  ;;  %v1113_v46 = vsel %vm750_vm5, %v1070_v42, 0.0  ;;  %v1443_v47 = vpop.f32.mrb[14].mxu1 }
 0x169   :  { %v1108_v32 = vadd.f32 %v1107_v27, %v1106_v24  ;;  %798 = vst.msk [vmem:[%s2305_s4 + $0x78] sm:$0xff] %vm750_vm5, %v1443_v47  ;;  %v661_v49 = vpop.f32.mrb[15].mxu1  ;;  %v1073_v52 = vmul.f32 %v1443_v47, %v1443_v47  ;;  %v1018_v57 = vsel %vm750_vm5, %v1443_v47, 0.0 }
 0x16a   :  { %v1009_v31 = vadd.f32 %v1008_v29, %v1007_v26  ;;  %797 = vst.msk [vmem:[%s2305_s4 + $0x70] sm:$0xff] %vm750_vm5, %v661_v49  ;;  %v1016_v53 = vsel %vm750_vm5, %v661_v49, 0.0  ;;  %v1072_v54 = vmul.f32 %v661_v49, %v661_v49 }
 0x16b   :  { %v1110_v36 = vadd.f32 %v1109_v34, %v1108_v32  ;;  %v1119_v63 = vsel %vm750_vm5, %v1073_v52, 0.0 }
 0x16c   :  { %v1011_v38 = vadd.f32 %v1010_v33, %v1009_v31  ;;  %v1117_v58 = vsel %vm750_vm5, %v1072_v54, 0.0  ;;  %v1446_v59 = vpop.f32.mrb[16].mxu1 }
 0x16d   :  { %v1112_v44 = vadd.f32 %v1111_v39, %v1110_v36  ;;  %800 = vst.msk [vmem:[%s2305_s4 + $0x88] sm:$0xff] %vm750_vm5, %v1446_v59  ;;  %v671_v61 = vpop.f32.mrb[17].mxu1  ;;  %v1075_v0 = vmul.f32 %v1446_v59, %v1446_v59  ;;  %v1022_v5 = vsel %vm750_vm5, %v1446_v59, 0.0 }
 0x16e   :  { %v1013_v43 = vadd.f32 %v1012_v41, %v1011_v38  ;;  %799 = vst.msk [vmem:[%s2305_s4 + $0x80] sm:$0xff] %vm750_vm5, %v671_v61  ;;  %v1020_v1 = vsel %vm750_vm5, %v671_v61, 0.0  ;;  %v1074_v2 = vmul.f32 %v671_v61, %v671_v61 }
 0x16f   :  { %v1114_v48 = vadd.f32 %v1113_v46, %v1112_v44  ;;  %v1123_v11 = vsel %vm750_vm5, %v1075_v0, 0.0 }
 0x170   :  { %v1015_v50 = vadd.f32 %v1014_v45, %v1013_v43  ;;  %v1121_v6 = vsel %vm750_vm5, %v1074_v2, 0.0  ;;  %v1449_v7 = vpop.f32.mrb[18].mxu1 }
 0x171   :  { %v1116_v56 = vadd.f32 %v1115_v51, %v1114_v48  ;;  %802 = vst.msk [vmem:[%s2305_s4 + $0x98] sm:$0xff] %vm750_vm5, %v1449_v7  ;;  %v681_v9 = vpop.f32.mrb[19].mxu1  ;;  %v1077_v12 = vmul.f32 %v1449_v7, %v1449_v7  ;;  %v1026_v17 = vsel %vm750_vm5, %v1449_v7, 0.0 }
 0x172   :  { %v1017_v55 = vadd.f32 %v1016_v53, %v1015_v50  ;;  %801 = vst.msk [vmem:[%s2305_s4 + $0x90] sm:$0xff] %vm750_vm5, %v681_v9  ;;  %v1024_v13 = vsel %vm750_vm5, %v681_v9, 0.0  ;;  %v1076_v14 = vmul.f32 %v681_v9, %v681_v9 }
 0x173   :  { %v1118_v60 = vadd.f32 %v1117_v58, %v1116_v56  ;;  %v1127_v23 = vsel %vm750_vm5, %v1077_v12, 0.0 }
 0x174   :  { %v1019_v62 = vadd.f32 %v1018_v57, %v1017_v55  ;;  %v1125_v18 = vsel %vm750_vm5, %v1076_v14, 0.0  ;;  %v1452_v19 = vpop.f32.mrb[20].mxu1 }
 0x175   :  { %v1120_v4 = vadd.f32 %v1119_v63, %v1118_v60  ;;  %804 = vst.msk [vmem:[%s2305_s4 + $0xa8] sm:$0xff] %vm750_vm5, %v1452_v19  ;;  %v691_v21 = vpop.f32.mrb[21].mxu1  ;;  %v1079_v24 = vmul.f32 %v1452_v19, %v1452_v19  ;;  %v1030_v29 = vsel %vm750_vm5, %v1452_v19, 0.0 }
 0x176   :  { %v1021_v3 = vadd.f32 %v1020_v1, %v1019_v62  ;;  %803 = vst.msk [vmem:[%s2305_s4 + $0xa0] sm:$0xff] %vm750_vm5, %v691_v21  ;;  %v1028_v25 = vsel %vm750_vm5, %v691_v21, 0.0  ;;  %v1078_v26 = vmul.f32 %v691_v21, %v691_v21 }
 0x177   :  { %v1122_v8 = vadd.f32 %v1121_v6, %v1120_v4  ;;  %v1131_v35 = vsel %vm750_vm5, %v1079_v24, 0.0 }
 0x178   :  { %v1023_v10 = vadd.f32 %v1022_v5, %v1021_v3  ;;  %v1129_v30 = vsel %vm750_vm5, %v1078_v26, 0.0  ;;  %v1455_v31 = vpop.f32.mrb[22].mxu1 }
 0x179   :  { %v1124_v16 = vadd.f32 %v1123_v11, %v1122_v8  ;;  %806 = vst.msk [vmem:[%s2305_s4 + $0xb8] sm:$0xff] %vm750_vm5, %v1455_v31  ;;  %v701_v33 = vpop.f32.mrb[23].mxu1  ;;  %v1081_v36 = vmul.f32 %v1455_v31, %v1455_v31  ;;  %v1034_v41 = vsel %vm750_vm5, %v1455_v31, 0.0 }
 0x17a   :  { %v1025_v15 = vadd.f32 %v1024_v13, %v1023_v10  ;;  %805 = vst.msk [vmem:[%s2305_s4 + $0xb0] sm:$0xff] %vm750_vm5, %v701_v33  ;;  %v1032_v37 = vsel %vm750_vm5, %v701_v33, 0.0  ;;  %v1080_v38 = vmul.f32 %v701_v33, %v701_v33 }
 0x17b   :  { %v1126_v20 = vadd.f32 %v1125_v18, %v1124_v16  ;;  %v1135_v47 = vsel %vm750_vm5, %v1081_v36, 0.0 }
 0x17c   :  { %v1027_v22 = vadd.f32 %v1026_v17, %v1025_v15  ;;  %v1133_v42 = vsel %vm750_vm5, %v1080_v38, 0.0  ;;  %v1458_v43 = vpop.f32.mrb[24].mxu1 }
 0x17d   :  { %v1128_v28 = vadd.f32 %v1127_v23, %v1126_v20  ;;  %808 = vst.msk [vmem:[%s2305_s4 + $0xc8] sm:$0xff] %vm750_vm5, %v1458_v43  ;;  %v711_v45 = vpop.f32.mrb[25].mxu1  ;;  %v1083_v48 = vmul.f32 %v1458_v43, %v1458_v43  ;;  %v1038_v53 = vsel %vm750_vm5, %v1458_v43, 0.0 }
 0x17e   :  { %v1029_v27 = vadd.f32 %v1028_v25, %v1027_v22  ;;  %807 = vst.msk [vmem:[%s2305_s4 + $0xc0] sm:$0xff] %vm750_vm5, %v711_v45  ;;  %v1036_v49 = vsel %vm750_vm5, %v711_v45, 0.0  ;;  %v1082_v50 = vmul.f32 %v711_v45, %v711_v45 }
 0x17f   :  { %v1130_v32 = vadd.f32 %v1129_v30, %v1128_v28  ;;  %v1139_v59 = vsel %vm750_vm5, %v1083_v48, 0.0 }
 0x180   :  { %v1031_v34 = vadd.f32 %v1030_v29, %v1029_v27  ;;  %v1137_v54 = vsel %vm750_vm5, %v1082_v50, 0.0  ;;  %v1461_v55 = vpop.f32.mrb[26].mxu1 }
 0x181   :  { %v1132_v40 = vadd.f32 %v1131_v35, %v1130_v32  ;;  %810 = vst.msk [vmem:[%s2305_s4 + $0xd8] sm:$0xff] %vm750_vm5, %v1461_v55  ;;  %v721_v57 = vpop.f32.mrb[27].mxu1  ;;  %v1085_v60 = vmul.f32 %v1461_v55, %v1461_v55  ;;  %v1042_v1 = vsel %vm750_vm5, %v1461_v55, 0.0 }
 0x182   :  { %v1033_v39 = vadd.f32 %v1032_v37, %v1031_v34  ;;  %809 = vst.msk [vmem:[%s2305_s4 + $0xd0] sm:$0xff] %vm750_vm5, %v721_v57  ;;  %v1040_v61 = vsel %vm750_vm5, %v721_v57, 0.0  ;;  %v1084_v62 = vmul.f32 %v721_v57, %v721_v57 }
 0x183   :  { %v1134_v44 = vadd.f32 %v1133_v42, %v1132_v40  ;;  %v1143_v7 = vsel %vm750_vm5, %v1085_v60, 0.0 }
 0x184   :  { %v1035_v46 = vadd.f32 %v1034_v41, %v1033_v39  ;;  %v1141_v2 = vsel %vm750_vm5, %v1084_v62, 0.0  ;;  %v1464_v3 = vpop.f32.mrb[28].mxu1 }
 0x185   :  { %v1136_v52 = vadd.f32 %v1135_v47, %v1134_v44  ;;  %812 = vst.msk [vmem:[%s2305_s4 + $0xe8] sm:$0xff] %vm750_vm5, %v1464_v3  ;;  %v731_v5 = vpop.f32.mrb[29].mxu1  ;;  %v1087_v8 = vmul.f32 %v1464_v3, %v1464_v3  ;;  %v1046_v13 = vsel %vm750_vm5, %v1464_v3, 0.0 }
 0x186   :  { %v1037_v51 = vadd.f32 %v1036_v49, %v1035_v46  ;;  %811 = vst.msk [vmem:[%s2305_s4 + $0xe0] sm:$0xff] %vm750_vm5, %v731_v5  ;;  %v1044_v9 = vsel %vm750_vm5, %v731_v5, 0.0  ;;  %v1086_v10 = vmul.f32 %v731_v5, %v731_v5 }
 0x187   :  { %v1138_v56 = vadd.f32 %v1137_v54, %v1136_v52  ;;  %v1147_v19 = vsel %vm750_vm5, %v1087_v8, 0.0 }
 0x188   :  { %v1039_v58 = vadd.f32 %v1038_v53, %v1037_v51  ;;  %v1145_v14 = vsel %vm750_vm5, %v1086_v10, 0.0  ;;  %v1467_v15 = vpop.f32.mrb[30].mxu1 }
 0x189   :  { %v1140_v0 = vadd.f32 %v1139_v59, %v1138_v56  ;;  %814 = vst.msk [vmem:[%s2305_s4 + $0xf8] sm:$0xff] %vm750_vm5, %v1467_v15  ;;  %v741_v17 = vpop.f32.mrb[31].mxu1  ;;  %v1089_v20 = vmul.f32 %v1467_v15, %v1467_v15  ;;  %v1050_v25 = vsel %vm750_vm5, %v1467_v15, 0.0 }
 0x18a   :  { %v1041_v63 = vadd.f32 %v1040_v61, %v1039_v58  ;;  %813 = vst.msk [vmem:[%s2305_s4 + $0xf0] sm:$0xff] %vm750_vm5, %v741_v17  ;;  %v1048_v21 = vsel %vm750_vm5, %v741_v17, 0.0  ;;  %v1088_v22 = vmul.f32 %v741_v17, %v741_v17  ;;  %s1553_s4 = smov [#allocation4]  }
 0x18b   :  { %v1142_v4 = vadd.f32 %v1141_v2, %v1140_v0  ;;  %v1151_v29 = vsel %vm750_vm5, %v1089_v20, 0.0  ;;  %s1181_s0 = sshll.u32 %s1553_s4, 4  ;;  %s1182_s0 = int_to_ptr.vmem [resolvable:$true] %s1181_s0 }
 0x18c   :  { %v1043_v6 = vadd.f32 %v1042_v1, %v1041_v63  ;;  %v1149_v26 = vsel %vm750_vm5, %v1088_v22, 0.0  ;;  %s1524_s25 = scalar_lea.vmem %s1182_s0, 32  ;;  %p1529_p9 = scmp.lt.s32.totalorder %s1182_s0, %s1182_s0 }
 0x18d   :  { %v1144_v12 = vadd.f32 %v1143_v7, %v1142_v4  ;;  %p1525_p8 = scmp.ne.s32.totalorder %s1182_s0, %s1524_s25  ;;  %p1530_p10 = scmp.lt.s32.totalorder %s1524_s25, %s1524_s25 }
 0x18e   :  { %v1045_v11 = vadd.f32 %v1044_v9, %v1043_v6 }
 0x18f   :  { %v1146_v16 = vadd.f32 %v1145_v14, %v1144_v12  ;;  %p1531_p11 = por %p1530_p10, %p1529_p9 }
 0x190   :  { %v1047_v18 = vadd.f32 %v1046_v13, %v1045_v11 }
 0x191   :  { %v1148_v24 = vadd.f32 %v1147_v19, %v1146_v16  ;;  %p1532_p12 = pnand %p1531_p11, %p1525_p8 }
 0x192   :  { %v1049_v23 = vadd.f32 %v1048_v21, %v1047_v18 }
 0x193   :  { %v1150_v28 = vadd.f32 %v1149_v26, %v1148_v24 }
 0x194   :  { %v1051_v27 = vadd.f32 %v1050_v25, %v1049_v23 }
 0x195   :  { %v1152_v31 = vadd.f32 %v1151_v29, %v1150_v28 }
 0x196   :  { %v1052_v30 = vrot.slane %v1051_v27, 4 }
 0x197   :  { %v1153_v33 = vrot.slane %v1152_v31, 4 }
 0x198   :  { %v1053_v32 = vadd.f32 %v1052_v30, %v1051_v27 }
 0x199   :  { %v1154_v35 = vadd.f32 %v1153_v33, %v1152_v31 }
 0x19a   :  { %v1054_v34 = vrot.slane %v1053_v32, 2 }
 0x19b   :  { %v1155_v37 = vrot.slane %v1154_v35, 2 }
 0x19c   :  { %v1055_v36 = vadd.f32 %v1054_v34, %v1053_v32 }
 0x19d   :  { %v1156_v39 = vadd.f32 %v1155_v37, %v1154_v35 }
 0x19e   :  { %v1056_v38 = vrot.slane %v1055_v36, 1 }
 0x19f   :  { %v1157_v40 = vrot.slane %v1156_v39, 1 }
 0x1a0   :  { %v1057_v41 = vadd.f32 %v1056_v38, %v1055_v36 }
 0x1a1   :  { %v1158_v42 = vadd.f32 %v1157_v40, %v1156_v39 }
 0x1a3   :  { %v1159_v43 = vsel %vm985_vm6, %v1057_v41, %v1158_v42 }
 0x1a4   :  { %1160 = vst.msk [vmem:[#allocation4] sm:$0x3] %vm987_vm7, %v1159_v43 }
 0x1a5   :  { %1535 = shalt.err (!%p1532_p12)
}
 0x1a6   :  { %s1536_s20 = scalar_lea.hbm %s2307_s6, 32 }
 0x1a7   :  { %p1537_p13 = scmp.ne.s32.totalorder %s2307_s6, %s1536_s20  ;;  %p1540_p0 = scmp.lt.u32.totalorder %s1536_s20, %s2307_s6 }
 0x1a9   :  { %p1542_p1 = pnand %p1540_p0, %p1537_p13 }
 0x1ab   :  { %1545 = shalt.err (!%p1542_p1)
}
 0x1ac   :  { %1184 = dma.vmem_to_hbm [thread:$0]  %s1182_s0, 32, %s2307_s6, [#allocation5]  }
 0x1ad   :  { %1546 = dma.done.wait [#allocation3], 32  }
 0x1ae   :  { %1547 = vsyncadd [#allocation3], 4294967264 }
 0x1af   :  { %1548 = dma.done.wait [#allocation5], 32  }
 0x1b0   :  { %1549 = vsyncadd [#allocation5], 4294967264 }
 0x1b1   :  { %1195 = vsyncpa [#allocation3], 1 }
 0x1b2   :  { %1196 = vsyncpa [#allocation5], 1 }

</bundles_post_ra>
